<compile_context>
chip_gen: v5e
topology: v5e:2x2
jax: 0.10.0
libtpu: 0.0.40
codegen_flags: <defaults>
</compile_context>

<pallas_src>
import math

import jax
import jax.numpy as jnp
from jax.experimental import pallas as pl
from jax.experimental.pallas import tpu as pltpu  # noqa: F401 (TPU backend)

# ---- small, module-consistent config ---------------------------------------
BATCH = 2
SEQ = 8
HIDDEN = 32
NUM_HEADS = 4
NUM_KV_HEADS = 4            # must equal NUM_HEADS for this forward()
HEAD_DIM = HIDDEN // NUM_HEADS
ROPE_THETA = 10000.0
MAX_POS = 2048

# fail loudly on configs this forward() cannot express
assert NUM_KV_HEADS == NUM_HEADS, "forward() has no repeat_kv path (MHA only)"
assert HEAD_DIM % 2 == 0, "rotate_half requires an even head_dim"
assert NUM_HEADS * HEAD_DIM == HIDDEN


# -----------------------------------------------------------------------------
# Pallas kernel: whole forward (q/k/v proj, RoPE, softmax, context, out proj)
# for all batches and all heads in one invocation.
# -----------------------------------------------------------------------------
def llama_attention_kernel(x_ref, wq_ref, wqr_ref, wk_ref, wkr_ref, wv_ref,
                           wo_ref, cos_ref, sin_ref, mask_ref, o_ref):
    f32 = jnp.float32
    x = x_ref[...]                       # [T, H]   T = B*S
    cos = cos_ref[...]                   # [T, H]   per-head tiled
    sin = sin_ref[...]                   # [T, H]
    mask = mask_ref[...]                 # [T, T]   block-diagonal additive

    # projections (MXU). wqr/wkr are column-permuted+negated copies of wq/wk,
    # so x @ wqr == rotate_half(x @ wq) exactly — no in-kernel lane shuffles.
    q = jnp.dot(x, wq_ref[...], preferred_element_type=f32)     # [T, H]
    qr = jnp.dot(x, wqr_ref[...], preferred_element_type=f32)   # rotate_half(q)
    k = jnp.dot(x, wk_ref[...], preferred_element_type=f32)
    kr = jnp.dot(x, wkr_ref[...], preferred_element_type=f32)
    v = jnp.dot(x, wv_ref[...], preferred_element_type=f32)

    # RoPE once over the full [T, H] tensors; fold the score scale into q.
    scale = 1.0 / math.sqrt(HEAD_DIM)
    q = (q * cos + qr * sin) * scale
    k = k * cos + kr * sin

    def split_heads(t):                  # [T, H] -> [NUM_HEADS, T, HEAD_DIM]
        return jnp.stack(
            [t[:, h * HEAD_DIM:(h + 1) * HEAD_DIM] for h in range(NUM_HEADS)],
            axis=0)

    qh = split_heads(q)
    kh = split_heads(k)
    vh = split_heads(v)

    # batched attention for all heads at once (MXU batched matmuls)
    scores = jnp.einsum("hqd,hkd->hqk", qh, kh, preferred_element_type=f32)
    scores = scores + mask[None, :, :]   # [NUM_HEADS, T, T]

    # f32 softmax (matches Softmax(dim=-1, dtype=float32))
    m = jnp.max(scores, axis=-1, keepdims=True)
    e = jnp.exp(scores - m)
    denom = jnp.sum(e, axis=-1, keepdims=True)
    r = pl.reciprocal(denom, approx=True)       # EUP slot
    r = r * (2.0 - denom * r)                   # one Newton step -> ~f32 exact
    p = e * r

    ctx = jnp.einsum("hqk,hkd->hqd", p, vh, preferred_element_type=f32)
    ctx_flat = jnp.concatenate([ctx[h] for h in range(NUM_HEADS)], axis=-1)

    # single output projection [T,H] x [H,H]
    o_ref[...] = jnp.dot(ctx_flat, wo_ref[...],
                         preferred_element_type=f32).astype(o_ref.dtype)
    # NOTE: at these shapes repacking the [T,32] result to a 128-lane-dense
    # slab would cost an in-kernel relayout larger than the masked stores it
    # saves, so the output stays [T, H].


# -----------------------------------------------------------------------------
# Wrapper: host-side cache/weight prep + pallas_call (no grid: one invocation).
# -----------------------------------------------------------------------------
def _rotate_half_weight(w_t):
    """Build W_rot with x @ W_rot == rotate_half(x @ W_t) per head (exact)."""
    in_f, out_f = w_t.shape
    half = HEAD_DIM // 2
    w3 = w_t.reshape(in_f, NUM_HEADS, HEAD_DIM)
    w_rot = jnp.concatenate([-w3[..., half:], w3[..., :half]], axis=-1)
    return w_rot.reshape(in_f, out_f)


def llama_attention_pallas(x, wq_t, wk_t, wv_t, wo_t, cos, sin, attn_mask):
    B, S, H = x.shape
    T = B * S
    x_flat = x.reshape(T, H)

    # RoPE caches tiled to [T, H]: per head along features, per batch along rows.
    cos_full = jnp.tile(jnp.tile(cos, (1, NUM_HEADS)), (B, 1)).astype(jnp.float32)
    sin_full = jnp.tile(jnp.tile(sin, (1, NUM_HEADS)), (B, 1)).astype(jnp.float32)

    wq_rot = _rotate_half_weight(wq_t)
    wk_rot = _rotate_half_weight(wk_t)

    # Block-diagonal additive mask: per-batch HF mask on the diagonal blocks,
    # -1e9 elsewhere so cross-batch attention is zeroed exactly by the softmax.
    mask_full = jnp.full((T, T), -1e9, jnp.float32)
    for b in range(B):
        mask_full = mask_full.at[b * S:(b + 1) * S, b * S:(b + 1) * S].set(
            attn_mask[b, 0].astype(jnp.float32))

    flops = (2 * T * H * H * 6                      # 5 projections + out proj
             + 2 * NUM_HEADS * T * T * HEAD_DIM * 2  # scores + context
             + 10 * T * H)                           # rope / scaling elementwise
    bytes_accessed = 4 * (T * H + 6 * H * H + 2 * T * H + T * T + T * H)
    cost = pl.CostEstimate(flops=flops,
                           transcendentals=NUM_HEADS * T * T,
                           bytes_accessed=bytes_accessed)

    out_flat = pl.pallas_call(
        llama_attention_kernel,
        out_shape=jax.ShapeDtypeStruct((T, H), x.dtype),
        cost_estimate=cost,
    )(x_flat, wq_t, wq_rot, wk_t, wk_rot, wv_t, wo_t,
      cos_full, sin_full, mask_full)

    return out_flat.reshape(B, S, H)


# -----------------------------------------------------------------------------
# Glue: rotary cache (LlamaRotaryEmbedding, rope_scaling=None) and reference.
# -----------------------------------------------------------------------------
def build_rope_cache(position_ids, head_dim, base=ROPE_THETA):
    inv_freq = 1.0 / (base ** (jnp.arange(0, head_dim, 2, dtype=jnp.float32) / head_dim))
    t = jnp.arange(MAX_POS, dtype=jnp.float32)
    freqs = jnp.einsum("i,j->ij", t, inv_freq)            # [MAX_POS, hd/2]
    emb = jnp.concatenate([freqs, freqs], axis=-1)         # [MAX_POS, hd]
    return jnp.cos(emb)[position_ids], jnp.sin(emb)[position_ids]   # [S, hd]


def rotate_half(x):
    half = x.shape[-1] // 2
    return jnp.concatenate([-x[..., half:], x[..., :half]], axis=-1)


def reference_attention(x, wq_t, wk_t, wv_t, wo_t, cos, sin, attn_mask):
    B, S, H = x.shape
    q = (x @ wq_t).reshape(B, S, NUM_HEADS, HEAD_DIM).transpose(0, 2, 1, 3)
    k = (x @ wk_t).reshape(B, S, NUM_KV_HEADS, HEAD_DIM).transpose(0, 2, 1, 3)
    v = (x @ wv_t).reshape(B, S, NUM_KV_HEADS, HEAD_DIM).transpose(0, 2, 1, 3)
    cosb = cos[None, None]
    sinb = sin[None, None]
    q = q * cosb + rotate_half(q) * sinb
    k = k * cosb + rotate_half(k) * sinb
    scores = jnp.einsum("bhqd,bhkd->bhqk", q, k) / math.sqrt(HEAD_DIM)
    scores = scores + attn_mask
    p = jax.nn.softmax(scores.astype(jnp.float32), axis=-1)
    ctx = jnp.einsum("bhqk,bhkd->bhqd", p, v)
    return ctx.transpose(0, 2, 1, 3).reshape(B, S, H) @ wo_t


if __name__ == "__main__":
    key = jax.random.PRNGKey(0)
    k_x, k_q, k_k, k_v, k_o = jax.random.split(key, 5)

    # deterministic synthetic parameters (nn.Linear weights pre-transposed)
    scale = 0.02
    hidden_states = jax.random.normal(k_x, (BATCH, SEQ, HIDDEN), jnp.float32)
    wq_t = scale * jax.random.normal(k_q, (HIDDEN, NUM_HEADS * HEAD_DIM), jnp.float32)
    wk_t = scale * jax.random.normal(k_k, (HIDDEN, NUM_KV_HEADS * HEAD_DIM), jnp.float32)
    wv_t = scale * jax.random.normal(k_v, (HIDDEN, NUM_KV_HEADS * HEAD_DIM), jnp.float32)
    wo_t = scale * jax.random.normal(k_o, (NUM_HEADS * HEAD_DIM, HIDDEN), jnp.float32)

    # position_ids = arange(S); HF-style additive causal mask [B,1,S,S]
    position_ids = jnp.arange(SEQ)
    cos, sin = build_rope_cache(position_ids, HEAD_DIM)
    causal = jnp.where(
        jnp.arange(SEQ)[:, None] >= jnp.arange(SEQ)[None, :], 0.0, -1e9
    ).astype(jnp.float32)
    attn_mask = jnp.broadcast_to(causal[None, None], (BATCH, 1, SEQ, SEQ))

    out = llama_attention_pallas(hidden_states, wq_t, wk_t, wv_t, wo_t,
                                 cos, sin, attn_mask)
    out = jax.block_until_ready(out)

    ref = reference_attention(hidden_states, wq_t, wk_t, wv_t, wo_t,
                              cos, sin, attn_mask)
    if not jnp.allclose(out, ref, atol=1e-4, rtol=1e-4):
        raise AssertionError("Pallas output does not match reference")

    # TODO(synk): attn_weights (output_attentions=True) and past_key_value cache
    # are not returned; forward() default path returns None for both.
    print("KERNEL_OK")
</pallas_src>

<mosaic_0001>
module attributes {stable_mosaic.version = 11 : i64} {
  func.func @llama_attention_kernel(%arg0: memref<16x32xf32, #tpu.memory_space<vmem>>, %arg1: memref<32x32xf32, #tpu.memory_space<vmem>>, %arg2: memref<32x32xf32, #tpu.memory_space<vmem>>, %arg3: memref<32x32xf32, #tpu.memory_space<vmem>>, %arg4: memref<32x32xf32, #tpu.memory_space<vmem>>, %arg5: memref<32x32xf32, #tpu.memory_space<vmem>>, %arg6: memref<32x32xf32, #tpu.memory_space<vmem>>, %arg7: memref<16x32xf32, #tpu.memory_space<vmem>>, %arg8: memref<16x32xf32, #tpu.memory_space<vmem>>, %arg9: memref<16x16xf32, #tpu.memory_space<vmem>>, %arg10: memref<16x32xf32, #tpu.memory_space<vmem>>) attributes {dimension_semantics = [], scalar_prefetch = 0 : i64, scratch_operands = 0 : i64, tpu.core_type = #tpu.core_type<tc>} {
    %c0 = arith.constant 0 : index
    %c0_0 = arith.constant 0 : index
    %0 = vector.load %arg0[%c0, %c0_0] : memref<16x32xf32, #tpu.memory_space<vmem>>, vector<16x32xf32>
    %c0_1 = arith.constant 0 : index
    %c0_2 = arith.constant 0 : index
    %1 = vector.load %arg7[%c0_1, %c0_2] : memref<16x32xf32, #tpu.memory_space<vmem>>, vector<16x32xf32>
    %c0_3 = arith.constant 0 : index
    %c0_4 = arith.constant 0 : index
    %2 = vector.load %arg8[%c0_3, %c0_4] : memref<16x32xf32, #tpu.memory_space<vmem>>, vector<16x32xf32>
    %c0_5 = arith.constant 0 : index
    %c0_6 = arith.constant 0 : index
    %3 = vector.load %arg9[%c0_5, %c0_6] : memref<16x16xf32, #tpu.memory_space<vmem>>, vector<16x16xf32>
    %c0_7 = arith.constant 0 : index
    %c0_8 = arith.constant 0 : index
    %4 = vector.load %arg1[%c0_7, %c0_8] : memref<32x32xf32, #tpu.memory_space<vmem>>, vector<32x32xf32>
    %cst = arith.constant dense<0.000000e+00> : vector<16x32xf32>
    %5 = tpu.matmul %0, %4, %cst {dimension_numbers = #tpu.dot_dimension_numbers<[1], [0], [0], [1], [0, 0, 1, 1], [], []>} : vector<16x32xf32>, vector<32x32xf32>, vector<16x32xf32> -> vector<16x32xf32>
    %c0_9 = arith.constant 0 : index
    %c0_10 = arith.constant 0 : index
    %6 = vector.load %arg2[%c0_9, %c0_10] : memref<32x32xf32, #tpu.memory_space<vmem>>, vector<32x32xf32>
    %cst_11 = arith.constant dense<0.000000e+00> : vector<16x32xf32>
    %7 = tpu.matmul %0, %6, %cst_11 {dimension_numbers = #tpu.dot_dimension_numbers<[1], [0], [0], [1], [0, 0, 1, 1], [], []>} : vector<16x32xf32>, vector<32x32xf32>, vector<16x32xf32> -> vector<16x32xf32>
    %c0_12 = arith.constant 0 : index
    %c0_13 = arith.constant 0 : index
    %8 = vector.load %arg3[%c0_12, %c0_13] : memref<32x32xf32, #tpu.memory_space<vmem>>, vector<32x32xf32>
    %cst_14 = arith.constant dense<0.000000e+00> : vector<16x32xf32>
    %9 = tpu.matmul %0, %8, %cst_14 {dimension_numbers = #tpu.dot_dimension_numbers<[1], [0], [0], [1], [0, 0, 1, 1], [], []>} : vector<16x32xf32>, vector<32x32xf32>, vector<16x32xf32> -> vector<16x32xf32>
    %c0_15 = arith.constant 0 : index
    %c0_16 = arith.constant 0 : index
    %10 = vector.load %arg4[%c0_15, %c0_16] : memref<32x32xf32, #tpu.memory_space<vmem>>, vector<32x32xf32>
    %cst_17 = arith.constant dense<0.000000e+00> : vector<16x32xf32>
    %11 = tpu.matmul %0, %10, %cst_17 {dimension_numbers = #tpu.dot_dimension_numbers<[1], [0], [0], [1], [0, 0, 1, 1], [], []>} : vector<16x32xf32>, vector<32x32xf32>, vector<16x32xf32> -> vector<16x32xf32>
    %c0_18 = arith.constant 0 : index
    %c0_19 = arith.constant 0 : index
    %12 = vector.load %arg5[%c0_18, %c0_19] : memref<32x32xf32, #tpu.memory_space<vmem>>, vector<32x32xf32>
    %cst_20 = arith.constant dense<0.000000e+00> : vector<16x32xf32>
    %13 = tpu.matmul %0, %12, %cst_20 {dimension_numbers = #tpu.dot_dimension_numbers<[1], [0], [0], [1], [0, 0, 1, 1], [], []>} : vector<16x32xf32>, vector<32x32xf32>, vector<16x32xf32> -> vector<16x32xf32>
    %14 = arith.mulf %5, %1 : vector<16x32xf32>
    %15 = arith.mulf %7, %2 : vector<16x32xf32>
    %16 = arith.addf %14, %15 : vector<16x32xf32>
    %cst_21 = arith.constant 0.353553385 : f32
    %17 = vector.broadcast %cst_21 : f32 to vector<16x32xf32>
    %18 = arith.mulf %16, %17 : vector<16x32xf32>
    %19 = arith.mulf %9, %1 : vector<16x32xf32>
    %20 = arith.mulf %11, %2 : vector<16x32xf32>
    %21 = arith.addf %19, %20 : vector<16x32xf32>
    %22 = vector.extract_strided_slice %18 {offsets = [0, 0], sizes = [16, 8], strides = [1, 1]} : vector<16x32xf32> to vector<16x8xf32>
    %23 = vector.extract_strided_slice %18 {offsets = [0, 8], sizes = [16, 8], strides = [1, 1]} : vector<16x32xf32> to vector<16x8xf32>
    %24 = vector.extract_strided_slice %18 {offsets = [0, 16], sizes = [16, 8], strides = [1, 1]} : vector<16x32xf32> to vector<16x8xf32>
    %25 = vector.extract_strided_slice %18 {offsets = [0, 24], sizes = [16, 8], strides = [1, 1]} : vector<16x32xf32> to vector<16x8xf32>
    %26 = vector.shape_cast %22 : vector<16x8xf32> to vector<1x16x8xf32>
    %27 = vector.shape_cast %23 : vector<16x8xf32> to vector<1x16x8xf32>
    %28 = vector.shape_cast %24 : vector<16x8xf32> to vector<1x16x8xf32>
    %29 = vector.shape_cast %25 : vector<16x8xf32> to vector<1x16x8xf32>
    %30 = tpu.concatenate %26, %27, %28, %29 in 0 : vector<1x16x8xf32>, vector<1x16x8xf32>, vector<1x16x8xf32>, vector<1x16x8xf32> -> vector<4x16x8xf32>
    %31 = vector.extract_strided_slice %21 {offsets = [0, 0], sizes = [16, 8], strides = [1, 1]} : vector<16x32xf32> to vector<16x8xf32>
    %32 = vector.extract_strided_slice %21 {offsets = [0, 8], sizes = [16, 8], strides = [1, 1]} : vector<16x32xf32> to vector<16x8xf32>
    %33 = vector.extract_strided_slice %21 {offsets = [0, 16], sizes = [16, 8], strides = [1, 1]} : vector<16x32xf32> to vector<16x8xf32>
    %34 = vector.extract_strided_slice %21 {offsets = [0, 24], sizes = [16, 8], strides = [1, 1]} : vector<16x32xf32> to vector<16x8xf32>
    %35 = vector.shape_cast %31 : vector<16x8xf32> to vector<1x16x8xf32>
    %36 = vector.shape_cast %32 : vector<16x8xf32> to vector<1x16x8xf32>
    %37 = vector.shape_cast %33 : vector<16x8xf32> to vector<1x16x8xf32>
    %38 = vector.shape_cast %34 : vector<16x8xf32> to vector<1x16x8xf32>
    %39 = tpu.concatenate %35, %36, %37, %38 in 0 : vector<1x16x8xf32>, vector<1x16x8xf32>, vector<1x16x8xf32>, vector<1x16x8xf32> -> vector<4x16x8xf32>
    %40 = vector.extract_strided_slice %13 {offsets = [0, 0], sizes = [16, 8], strides = [1, 1]} : vector<16x32xf32> to vector<16x8xf32>
    %41 = vector.extract_strided_slice %13 {offsets = [0, 8], sizes = [16, 8], strides = [1, 1]} : vector<16x32xf32> to vector<16x8xf32>
    %42 = vector.extract_strided_slice %13 {offsets = [0, 16], sizes = [16, 8], strides = [1, 1]} : vector<16x32xf32> to vector<16x8xf32>
    %43 = vector.extract_strided_slice %13 {offsets = [0, 24], sizes = [16, 8], strides = [1, 1]} : vector<16x32xf32> to vector<16x8xf32>
    %44 = vector.shape_cast %40 : vector<16x8xf32> to vector<1x16x8xf32>
    %45 = vector.shape_cast %41 : vector<16x8xf32> to vector<1x16x8xf32>
    %46 = vector.shape_cast %42 : vector<16x8xf32> to vector<1x16x8xf32>
    %47 = vector.shape_cast %43 : vector<16x8xf32> to vector<1x16x8xf32>
    %48 = tpu.concatenate %44, %45, %46, %47 in 0 : vector<1x16x8xf32>, vector<1x16x8xf32>, vector<1x16x8xf32>, vector<1x16x8xf32> -> vector<4x16x8xf32>
    "tpu.trace_start"() <{level = 10 : i32, message = "hqd,hkd->hqk"}> : () -> ()
    %cst_22 = arith.constant dense<0.000000e+00> : vector<4x16x16xf32>
    %49 = tpu.matmul %30, %39, %cst_22 {dimension_numbers = #tpu.dot_dimension_numbers<[2], [2], [1], [1], [0, 0, 0, 1, 1, 1], [0], [0]>} : vector<4x16x8xf32>, vector<4x16x8xf32>, vector<4x16x16xf32> -> vector<4x16x16xf32>
    "tpu.trace_stop"() : () -> ()
    %50 = vector.shape_cast %3 : vector<16x16xf32> to vector<1x16x16xf32>
    %51 = vector.broadcast %50 : vector<1x16x16xf32> to vector<4x16x16xf32>
    %52 = arith.addf %49, %51 : vector<4x16x16xf32>
    %cst_23 = arith.constant dense<0xFF800000> : vector<4x16xf32>
    %53 = vector.multi_reduction <maximumf>, %52, %cst_23 [2] : vector<4x16x16xf32> to vector<4x16xf32>
    %54 = vector.shape_cast %53 : vector<4x16xf32> to vector<4x16x1xf32>
    %55 = vector.broadcast %54 : vector<4x16x1xf32> to vector<4x16x16xf32>
    %56 = arith.subf %52, %55 : vector<4x16x16xf32>
    %57 = math.exp %56 : vector<4x16x16xf32>
    %cst_24 = arith.constant dense<0.000000e+00> : vector<4x16xf32>
    %58 = vector.multi_reduction <add>, %57, %cst_24 [2] : vector<4x16x16xf32> to vector<4x16xf32>
    %59 = vector.shape_cast %58 : vector<4x16xf32> to vector<4x16x1xf32>
    %60 = tpu.reciprocal %59 {approx = true} : vector<4x16x1xf32> -> vector<4x16x1xf32>
    %61 = arith.mulf %59, %60 : vector<4x16x1xf32>
    %cst_25 = arith.constant 2.000000e+00 : f32
    %62 = vector.broadcast %cst_25 : f32 to vector<4x16x1xf32>
    %63 = arith.subf %62, %61 : vector<4x16x1xf32>
    %64 = arith.mulf %60, %63 : vector<4x16x1xf32>
    %65 = vector.broadcast %64 : vector<4x16x1xf32> to vector<4x16x16xf32>
    %66 = arith.mulf %57, %65 : vector<4x16x16xf32>
    "tpu.trace_start"() <{level = 10 : i32, message = "hqk,hkd->hqd"}> : () -> ()
    %cst_26 = arith.constant dense<0.000000e+00> : vector<4x16x8xf32>
    %67 = tpu.matmul %66, %48, %cst_26 {dimension_numbers = #tpu.dot_dimension_numbers<[2], [1], [1], [2], [0, 0, 0, 1, 1, 2], [0], [0]>} : vector<4x16x16xf32>, vector<4x16x8xf32>, vector<4x16x8xf32> -> vector<4x16x8xf32>
    "tpu.trace_stop"() : () -> ()
    %68 = vector.extract_strided_slice %67 {offsets = [0, 0, 0], sizes = [1, 16, 8], strides = [1, 1, 1]} : vector<4x16x8xf32> to vector<1x16x8xf32>
    %69 = vector.shape_cast %68 : vector<1x16x8xf32> to vector<16x8xf32>
    %70 = vector.extract_strided_slice %67 {offsets = [1, 0, 0], sizes = [1, 16, 8], strides = [1, 1, 1]} : vector<4x16x8xf32> to vector<1x16x8xf32>
    %71 = vector.shape_cast %70 : vector<1x16x8xf32> to vector<16x8xf32>
    %72 = vector.extract_strided_slice %67 {offsets = [2, 0, 0], sizes = [1, 16, 8], strides = [1, 1, 1]} : vector<4x16x8xf32> to vector<1x16x8xf32>
    %73 = vector.shape_cast %72 : vector<1x16x8xf32> to vector<16x8xf32>
    %74 = vector.extract_strided_slice %67 {offsets = [3, 0, 0], sizes = [1, 16, 8], strides = [1, 1, 1]} : vector<4x16x8xf32> to vector<1x16x8xf32>
    %75 = vector.shape_cast %74 : vector<1x16x8xf32> to vector<16x8xf32>
    %76 = tpu.concatenate %69, %71, %73, %75 in 1 : vector<16x8xf32>, vector<16x8xf32>, vector<16x8xf32>, vector<16x8xf32> -> vector<16x32xf32>
    %c0_27 = arith.constant 0 : index
    %c0_28 = arith.constant 0 : index
    %77 = vector.load %arg6[%c0_27, %c0_28] : memref<32x32xf32, #tpu.memory_space<vmem>>, vector<32x32xf32>
    %cst_29 = arith.constant dense<0.000000e+00> : vector<16x32xf32>
    %78 = tpu.matmul %76, %77, %cst_29 {dimension_numbers = #tpu.dot_dimension_numbers<[1], [0], [0], [1], [0, 0, 1, 1], [], []>} : vector<16x32xf32>, vector<32x32xf32>, vector<16x32xf32> -> vector<16x32xf32>
    %c0_30 = arith.constant 0 : index
    %c0_31 = arith.constant 0 : index
    %79 = vector.load %arg10[%c0_30, %c0_31] : memref<16x32xf32, #tpu.memory_space<vmem>>, vector<16x32xf32>
    tpu.vector_store %arg10[%c0_30, %c0_31], %78 {strides = array<i32>} : memref<16x32xf32, #tpu.memory_space<vmem>>, vector<16x32xf32>,
    return
  }
}

</mosaic_0001>

<bundles_post_ra>
// kernel: tpu_custom_call.1
= control target key start
LH: loop header
LB: loop body
LE: loop exit
PB: predicated region body
PF: predicated region fallthrough
CT: control target
= control target key end

     0   :  { %15 = vsyncpa [#allocation3], 0  ;;  %s1508_s0 = inlined_call_operand.hbm [shape: f32[16,32], index: 0, kind: input, shape index: {}]   ;;  %s1509_s1 = inlined_call_operand.hbm [shape: f32[32,32], index: 1, kind: input, shape index: {}]   ;;  %s1510_s2 = inlined_call_operand.hbm [shape: f32[32,32], index: 2, kind: input, shape index: {}]   ;;  %s1511_s3 = inlined_call_operand.hbm [shape: f32[32,32], index: 3, kind: input, shape index: {}]   ;;  %s1512_s4 = inlined_call_operand.hbm [shape: f32[32,32], index: 4, kind: input, shape index: {}]   ;;  %s1513_s5 = inlined_call_operand.hbm [shape: f32[32,32], index: 5, kind: input, shape index: {}]   ;;  %s1514_s6 = inlined_call_operand.hbm [shape: f32[32,32], index: 6, kind: input, shape index: {}]   ;;  %s1515_s7 = inlined_call_operand.hbm [shape: f32[16,32], index: 7, kind: input, shape index: {}]   ;;  %s1516_s8 = inlined_call_operand.hbm [shape: f32[16,32], index: 8, kind: input, shape index: {}]   ;;  %s1517_s9 = inlined_call_operand.hbm [shape: f32[16,16], index: 9, kind: input, shape index: {}]   ;;  %s1518_s10 = inlined_call_operand.hbm [shape: f32[16,32], index: 10, kind: output, shape index: {}]  }
   0x1   :  { %16 = vsyncpa [#allocation6], 0 }
   0x2   :  { %17 = vsyncpa [#allocation9], 0 }
   0x3   :  { %18 = vsyncpa [#allocation12], 0 }
   0x4   :  { %19 = vsyncpa [#allocation15], 0 }
   0x5   :  { %20 = vsyncpa [#allocation18], 0 }
   0x6   :  { %21 = vsyncpa [#allocation4], 0  ;;  %s39_s15 = sshll.u32 %s1509_s1, 4  ;;  %s1235_s16 = smov [#allocation5]   ;;  %s40_s15 = int_to_ptr.hbm [resolvable:$true] %s39_s15 }
   0x7   :  { %s41_s17 = sshll.u32 %s1235_s16, 4  ;;  %s65_s20 = sshll.u32 %s1511_s3, 4  ;;  %s42_s17 = int_to_ptr.vmem [resolvable:$true] %s41_s17  ;;  %s66_s20 = int_to_ptr.hbm [resolvable:$true] %s65_s20 }
   0x8   :  { %s1236_s21 = smov 128   ;;  %s1237_s22 = smov 8  }
   0x9   :  { %47 = dma.hbm_to_vmem [thread:$0]  %s40_s15, 512, %s42_s17, [#allocation6], %s1236_s21, %s1236_s21, %s1237_s22  }
   0xa   :  { %s1238_s23 = smov [#allocation8]   ;;  %s91_s1 = sshll.u32 %s1513_s5, 4  ;;  %s92_s1 = int_to_ptr.hbm [resolvable:$true] %s91_s1 }
   0xb   :  { %s67_s24 = sshll.u32 %s1238_s23, 4  ;;  %s117_s28 = sshll.u32 %s1515_s7, 4  ;;  %s68_s24 = int_to_ptr.vmem [resolvable:$true] %s67_s24  ;;  %s118_s28 = int_to_ptr.hbm [resolvable:$true] %s117_s28 }
   0xc   :  { %73 = dma.hbm_to_vmem [thread:$0]  %s66_s20, 512, %s68_s24, [#allocation9], %s1236_s21, %s1236_s21, %s1237_s22  }
   0xd   :  { %s1239_s29 = smov [#allocation11]   ;;  %s1240_s11 = smov [#allocation14]  }
   0xe   :  { %s93_s30 = sshll.u32 %s1239_s29, 4  ;;  %s119_s5 = sshll.u32 %s1240_s11, 4  ;;  %s94_s30 = int_to_ptr.vmem [resolvable:$true] %s93_s30  ;;  %s120_s5 = int_to_ptr.vmem [resolvable:$true] %s119_s5 }
   0xf   :  { %99 = dma.hbm_to_vmem [thread:$0]  %s92_s1, 512, %s94_s30, [#allocation12], %s1236_s21, %s1236_s21, %s1237_s22  }
  0x10   :  { %s26_s14 = sshll.u32 %s1508_s0, 4  ;;  %s52_s16 = sshll.u32 %s1510_s2, 4  ;;  %s27_s14 = int_to_ptr.hbm [resolvable:$true] %s26_s14  ;;  %s53_s16 = int_to_ptr.hbm [resolvable:$true] %s52_s16 }
  0x11   :  { %125 = dma.hbm_to_vmem [thread:$0]  %s118_s28, 256, %s120_s5, [#allocation15], %s1236_s21, %s1236_s21, %s1237_s22  }
  0x12   :  { %s1241_s17 = smov [#allocation2]   ;;  %s1242_s19 = smov [#allocation7]  }
  0x13   :  { %s28_s18 = sshll.u32 %s1241_s17, 4  ;;  %s54_s0 = sshll.u32 %s1242_s19, 4  ;;  %s29_s18 = int_to_ptr.vmem [resolvable:$true] %s28_s18  ;;  %s55_s0 = int_to_ptr.vmem [resolvable:$true] %s54_s0 }
  0x14   :  { %34 = dma.hbm_to_vmem [thread:$0]  %s27_s14, 256, %s29_s18, [#allocation3], %s1236_s21, %s1236_s21, %s1237_s22  }
  0x15   :  { %s78_s24 = sshll.u32 %s1512_s4, 4  ;;  %s104_s26 = sshll.u32 %s1514_s6, 4  ;;  %s79_s24 = int_to_ptr.hbm [resolvable:$true] %s78_s24  ;;  %s105_s26 = int_to_ptr.hbm [resolvable:$true] %s104_s26 }
  0x16   :  { %60 = dma.hbm_to_vmem [thread:$0]  %s53_s16, 512, %s55_s0, [#allocation6], %s1236_s21, %s1236_s21, %s1237_s22  }
  0x17   :  { %s1243_s1 = smov [#allocation10]   ;;  %s1244_s27 = smov [#allocation13]  }
  0x18   :  { %s80_s3 = sshll.u32 %s1243_s1, 4  ;;  %s106_s4 = sshll.u32 %s1244_s27, 4  ;;  %s81_s3 = int_to_ptr.vmem [resolvable:$true] %s80_s3  ;;  %s107_s4 = int_to_ptr.vmem [resolvable:$true] %s106_s4 }
  0x19   :  { %86 = dma.hbm_to_vmem [thread:$0]  %s79_s24, 512, %s81_s3, [#allocation9], %s1236_s21, %s1236_s21, %s1237_s22  }
  0x1a   :  { %s130_s30 = sshll.u32 %s1516_s8, 4  ;;  %s143_s5 = sshll.u32 %s1517_s9, 4  ;;  %s131_s30 = int_to_ptr.hbm [resolvable:$true] %s130_s30  ;;  %s144_s5 = int_to_ptr.hbm [resolvable:$true] %s143_s5 }
  0x1b   :  { %112 = dma.hbm_to_vmem [thread:$0]  %s105_s26, 512, %s107_s4, [#allocation12], %s1236_s21, %s1236_s21, %s1237_s22  }
  0x1c   :  { %s1245_s12 = smov [#allocation16]   ;;  %s1246_s14 = smov [#allocation17]  }
  0x1d   :  { %s132_s13 = sshll.u32 %s1245_s12, 4  ;;  %s145_s8 = sshll.u32 %s1246_s14, 4  ;;  %s133_s13 = int_to_ptr.vmem [resolvable:$true] %s132_s13  ;;  %s146_s8 = int_to_ptr.vmem [resolvable:$true] %s145_s8 }
  0x1e   :  { %138 = dma.hbm_to_vmem [thread:$0]  %s131_s30, 256, %s133_s13, [#allocation15], %s1236_s21, %s1236_s21, %s1237_s22  }
  0x1f   :  { %151 = dma.hbm_to_vmem [thread:$0]  %s144_s5, 256, %s146_s8, [#allocation18], %s1236_s21, %s1236_s21, %s1237_s22  }
  0x20   :  { %1221 = dma.done.wait [#allocation3], 256  }
  0x21   :  { %1222 = vsyncadd [#allocation3], 4294967040 }
  0x22   :  { %1223 = dma.done.wait [#allocation6], 1024  }
  0x23   :  { %1224 = vsyncadd [#allocation6], 4294966272 }
  0x24   :  { %1225 = dma.done.wait [#allocation9], 1024  }
  0x25   :  { %1226 = vsyncadd [#allocation9], 4294966272 }
  0x26   :  { %1227 = dma.done.wait [#allocation12], 1024  }
  0x27   :  { %1228 = vsyncadd [#allocation12], 4294966272 }
  0x28   :  { %1229 = dma.done.wait [#allocation15], 512  }
  0x29   :  { %1230 = vsyncadd [#allocation15], 4294966784 }
  0x2a   :  { %1231 = dma.done.wait [#allocation18], 256  }
  0x2b   :  { %1232 = vsyncadd [#allocation18], 4294967040  ;;  %v203_v0 = vld [vmem:[#allocation5 + $0x18] sm:$0xff]  ;;  %v202_v2 = vld [vmem:[#allocation5 + $0x10] sm:$0xff]  ;;  %vm204_vm0 = vcmask 261120   ;;  %s1247_s9 = smov 120  }
  0x2c   :  { %v237_v1 = vld [vmem:[#allocation7 + $0x18] sm:$0xff]  ;;  %223 = vmatpush.msra.mxu0 %v203_v0  ;;  %884 = vmatpush.msra.mxu2 %v203_v0  ;;  %v236_v3 = vld [vmem:[#allocation7 + $0x10] sm:$0xff]  ;;  %v201_v4 = vld [vmem:[#allocation5 + $0x8] sm:$0xff]  ;;  %s1248_s7 = smov 112   ;;  %vm404_vm1 = vcmask 64512   ;;  %s1249_s15 = smov 104  }
  0x2d   :  { %250 = vmatpush.msra.mxu1 %v237_v1  ;;  %888 = vmatpush.msra.mxu3 %v237_v1  ;;  %v235_v5 = vld [vmem:[#allocation7 + $0x8] sm:$0xff]  ;;  %v200_v6 = vld [vmem:[#allocation5] sm:$0xff]  ;;  %v1368_v8 = vld [vmem:[#allocation2] sm:$0xff]  ;;  %vm529_vm2 = vcmask 130048   ;;  %s1250_s16 = smov 24   ;;  %s1251_s17 = smov 16  }
  0x2e   :  { %224 = vmatpush.msra.mxu0 %v202_v2  ;;  %885 = vmatpush.msra.mxu2 %v202_v2  ;;  %v234_v7 = vld [vmem:[#allocation7] sm:$0xff]  ;;  %v1370_v9 = vld [vmem:[#allocation2 + $0x8] sm:$0xff]  ;;  %v263_v12 = vld [vmem:[#allocation8 + $0x10] sm:$0xff]  ;;  %vm786_vm3 = vcmask 195584   ;;  %s1252_s18 = smov [#allocation19]   ;;  %s830_s23 = sshll.u32 %s1518_s10, 4  ;;  %s831_s23 = int_to_ptr.hbm [resolvable:$true] %s830_s23 }
  0x2f   :  { %251 = vmatpush.msra.mxu1 %v236_v3  ;;  %889 = vmatpush.msra.mxu3 %v236_v3  ;;  %v264_v10 = vld [vmem:[#allocation8 + $0x18] sm:$0xff]  ;;  %v290_v13 = vld [vmem:[#allocation10 + $0x10] sm:$0xff]  ;;  %v262_v14 = vld [vmem:[#allocation8 + $0x8] sm:$0xff]  ;;  %s828_s19 = sshll.u32 %s1252_s18, 4  ;;  %s829_s19 = int_to_ptr.vmem [resolvable:$true] %s828_s19 }
  0x30   :  { %225 = vmatpush.msra.mxu0 %v201_v4  ;;  %886 = vmatpush.msra.mxu2 %v201_v4  ;;  %v291_v11 = vld [vmem:[#allocation10 + $0x18] sm:$0xff]  ;;  %v289_v15 = vld [vmem:[#allocation10 + $0x8] sm:$0xff]  ;;  %v261_v16 = vld [vmem:[#allocation8] sm:$0xff] }
  0x31   :  { %252 = vmatpush.msra.mxu1 %v235_v5  ;;  %890 = vmatpush.msra.mxu3 %v235_v5  ;;  %v288_v17 = vld [vmem:[#allocation10] sm:$0xff]  ;;  %v196_v19 = vld [vmem:[#allocation16] sm:$0xff]  ;;  %v195_v28 = vld [vmem:[#allocation14 + $0x8] sm:$0xff] }
  0x32   :  { %226 = vmatpush.msra.mxu0 %v200_v6  ;;  %887 = vmatpush.msra.mxu2 %v200_v6  ;;  %v194_v18 = vld [vmem:[#allocation14] sm:$0xff]  ;;  %v197_v29 = vld [vmem:[#allocation16 + $0x8] sm:$0xff]  ;;  %v317_v45 = vld [vmem:[#allocation11 + $0x10] sm:$0xff] }
  0x33   :  { %253 = vmatpush.msra.mxu1 %v234_v7  ;;  %891 = vmatpush.msra.mxu3 %v234_v7  ;;  %v318_v44 = vld [vmem:[#allocation11 + $0x18] sm:$0xff]  ;;  %v316_v46 = vld [vmem:[#allocation11 + $0x8] sm:$0xff]  ;;  %v315_v47 = vld [vmem:[#allocation11] sm:$0xff] }
  0x34   :  { %848 = vmatmul.msk.f32.vlgmr.msra.gmra.mxu0 %vm204_vm0, %v1368_v8  ;;  %849 = vmatmul.msk.f32.vlgmr.msra.gmra.mxu2 %vm204_vm0, %v1370_v9  ;;  %v198_v56 = vld [vmem:[#allocation17] sm:$0xff] }
  0x35   :  { %850 = vmatmul.msk.f32.vlgmr.msra.gmra.mxu1 %vm204_vm0, %v1368_v8  ;;  %851 = vmatmul.msk.f32.vlgmr.msra.gmra.mxu3 %vm204_vm0, %v1370_v9 }
  0x36   :  { %277 = vmatpush.msrb.mxu2 %v264_v10  ;;  %304 = vmatpush.msrb.mxu3 %v291_v11 }
  0x37   :  { %331 = vmatpush.msrb.mxu0 %v318_v44 }
  0x38   :  { %278 = vmatpush.msrb.mxu2 %v263_v12  ;;  %305 = vmatpush.msrb.mxu3 %v290_v13 }
  0x39   :  { %332 = vmatpush.msrb.mxu0 %v317_v45 }
  0x3a   :  { %279 = vmatpush.msrb.mxu2 %v262_v14  ;;  %306 = vmatpush.msrb.mxu3 %v289_v15 }
  0x3b   :  { %333 = vmatpush.msrb.mxu0 %v316_v46 }
  0x3c   :  { %280 = vmatpush.msrb.mxu2 %v261_v16  ;;  %307 = vmatpush.msrb.mxu3 %v288_v17 }
  0x3d   :  { %852 = vmatmul.msk.f32.vlgmr.msrb.gmra.mxu2 %vm204_vm0, %v1368_v8  ;;  %854 = vmatmul.msk.f32.vlgmr.msrb.gmra.mxu3 %vm204_vm0, %v1368_v8 }
  0x3e   :  { %334 = vmatpush.msrb.mxu0 %v315_v47 }
  0x3f   :  { %856 = vmatmul.msk.f32.vlgmr.msrb.gmra.mxu0 %vm204_vm0, %v1368_v8 }
  0x45   :  { %853 = vmatmul.msk.f32.gmra.mxu2 %vm204_vm0, %v1370_v9  ;;  %855 = vmatmul.msk.f32.gmra.mxu3 %vm204_vm0, %v1370_v9 }
  0x47   :  { %857 = vmatmul.msk.f32.gmra.mxu0 %vm204_vm0, %v1370_v9  ;;  %v199_v9 = vld [vmem:[#allocation17 + $0x8] sm:$0xff] }
  0xb1   :  { %v228_v20 = vpop.f32.mrf.mxu0 }
  0xb2   :  { %v342_v21 = vmul.f32 %v228_v20, %v194_v18  ;;  %v255_v22 = vpop.f32.mrf.mxu1 }
  0xb3   :  { %v344_v23 = vmul.f32 %v255_v22, %v196_v19 }
  0xb5   :  { %v346_v24 = vadd.f32 %v344_v23, %v342_v21 }
  0xb7   :  { %v348_v25 = vmul.f32 0.35355338, %v346_v24  ;;  %v231_v26 = vpop.f32.mrf.mxu2 }
  0xb8   :  { %v258_v27 = vpop.f32.mrf.mxu3  ;;  %v343_v30 = vmul.f32 %v231_v26, %v195_v28 }
  0xb9   :  { %358 = vrot.lane.b32.xlu2 %v348_v25, %s1247_s9  ;;  %v345_v31 = vmul.f32 %v258_v27, %v197_v29 }
  0xbb   :  { %v347_v36 = vadd.f32 %v345_v31, %v343_v30 }
  0xbc   :  { %v336_v0 = vpop.f32.mrf.mxu0 }
  0xbd   :  { %v349_v38 = vmul.f32 0.35355338, %v347_v36 }
  0xc0   :  { %v282_v32 = vpop.f32.mrf.mxu2  ;;  %v309_v33 = vpop.f32.mrf.mxu3 }
  0xc1   :  { %v350_v34 = vmul.f32 %v282_v32, %v194_v18  ;;  %v352_v35 = vmul.f32 %v309_v33, %v196_v19  ;;  %362 = vrot.lane.b32.xlu2 %v348_v25, %s1248_s7 }
  0xc3   :  { %v354_v37 = vadd.f32 %v352_v35, %v350_v34 }
  0xc4   :  { %v339_v1 = vpop.f32.mrf.mxu0 }
  0xc5   :  { %372 = vrot.lane.b32.xlu1 %v354_v37, %s1247_s9  ;;  %v1424_v2 = vpack.i.bf16 %v336_v0, %v339_v1 }
  0xc8   :  { %v285_v39 = vpop.f32.mrf.mxu2  ;;  %v312_v40 = vpop.f32.mrf.mxu3 }
  0xc9   :  { %v351_v41 = vmul.f32 %v285_v39, %v195_v28  ;;  %v353_v42 = vmul.f32 %v312_v40, %v197_v29  ;;  %364 = vrot.lane.b32.xlu2 %v349_v38, %s1248_s7 }
  0xcb   :  { %v355_v43 = vadd.f32 %v353_v42, %v351_v41 }
  0xcd   :  { %376 = vrot.lane.b32.xlu1 %v354_v37, %s1248_s7  ;;  %374 = vrot.lane.b32.xlu0 %v355_v43, %s1247_s9 }
  0xce   :  { %858 = vmatpush.xpose.msk.msrb.mxu1 %vm404_vm1, %v355_v43 }
  0xd1   :  { %368 = vrot.lane.b32.xlu2 %v349_v38, %s1249_s15 }
  0xd2   :  { %859 = vmatpush.xpose.msk.msrb.mxu1 %vm404_vm1, %v354_v37 }
  0xd5   :  { %860 = vmatmul.msk.f32.vlgmr.msrb.gmra.mxu1 %vm404_vm1, %v348_v25  ;;  %360 = vrot.lane.b32.xlu1 %v349_v38, %s1247_s9 }
  0xd6   :  { %378 = vrot.lane.b32.xlu0 %v355_v43, %s1248_s7  ;;  %662 = vmatpush.msra.mxu1 %v339_v1 }
  0xd8   :  { %663 = vmatpush.msra.mxu1 %v336_v0 }
  0xdd   :  { %861 = vmatmul.msk.f32.gmra.mxu1 %vm404_vm1, %v349_v38  ;;  %366 = vrot.lane.b32.xlu1 %v348_v25, %s1249_s15 }
  0xde   :  { %382 = vrot.lane.b32.xlu0 %v355_v43, %s1249_s15 }
  0xe6   :  { %380 = vrot.lane.b32.xlu0 %v354_v37, %s1249_s15 }
 0x113   :  { %v359_v50 = vpop.permute.xlu2 %358 }
 0x11b   :  { %v363_v53 = vpop.permute.xlu2 %362 }
 0x123   :  { %v365_v60 = vpop.permute.xlu2 %364 }
 0x12b   :  { %v369_v63 = vpop.permute.xlu2 %368 }
 0x137   :  { %v373_v48 = vpop.permute.xlu1 %372 }
 0x13f   :  { %v375_v49 = vpop.permute.xlu0 %374  ;;  %v377_v51 = vpop.permute.xlu1 %376 }
 0x140   :  { %862 = vmatpush.xpose.msk.msra.mxu2 %vm404_vm1, %v375_v49 }
 0x144   :  { %863 = vmatpush.xpose.msk.msra.mxu2 %vm404_vm1, %v373_v48 }
 0x147   :  { %864 = vmatmul.msk.f32.vlgmr.msra.gmra.mxu2 %vm404_vm1, %v359_v50  ;;  %v361_v54 = vpop.permute.xlu1 %360 }
 0x148   :  { %v379_v52 = vpop.permute.xlu0 %378 }
 0x149   :  { %866 = vmatpush.xpose.msk.msra.mxu3 %vm404_vm1, %v379_v52 }
 0x14d   :  { %867 = vmatpush.xpose.msk.msra.mxu3 %vm404_vm1, %v377_v51 }
 0x14f   :  { %865 = vmatmul.msk.f32.gmra.mxu2 %vm404_vm1, %v361_v54  ;;  %v367_v62 = vpop.permute.xlu1 %366 }
 0x150   :  { %v383_v55 = vpop.permute.xlu0 %382  ;;  %868 = vmatmul.msk.f32.vlgmr.msra.gmra.mxu3 %vm404_vm1, %v363_v53 }
 0x151   :  { %870 = vmatpush.xpose.msk.msra.mxu0 %vm404_vm1, %v383_v55 }
 0x152   :  { %v430_v57 = vpop.f32.mrf.mxu1 }
 0x153   :  { %v1416_v58 = vadd.f32 %v430_v57, %v198_v56 }
 0x155   :  { %v530_v59 = vsel %vm529_vm2, %v1416_v58, -inf }
 0x156   :  { %531 = vmax.xlane.f32.xlu2 %v530_v59 }
 0x158   :  { %v381_v61 = vpop.permute.xlu0 %380  ;;  %869 = vmatmul.msk.f32.gmra.mxu3 %vm404_vm1, %v365_v60 }
 0x159   :  { %871 = vmatpush.xpose.msk.msra.mxu0 %vm404_vm1, %v381_v61 }
 0x15a   :  { %v433_v10 = vpop.f32.mrf.mxu1 }
 0x15b   :  { %v1428_v12 = vadd.f32 %v433_v10, %v199_v9 }
 0x15c   :  { %872 = vmatmul.msk.f32.vlgmr.msra.gmra.mxu0 %vm404_vm1, %v367_v62 }
 0x15d   :  { %v533_v19 = vsel %vm529_vm2, %v1428_v12, -inf }
 0x164   :  { %873 = vmatmul.msk.f32.gmra.mxu0 %vm404_vm1, %v369_v63 }
 0x1c9   :  { %v532_v28 = vpop.xlane.xlu2 %531 }
 0x1ca   :  { %v461_v3 = vpop.f32.mrf.mxu2  ;;  %v554_v59 = vsub.f32 %v1416_v58, %v532_v28 }
 0x1cb   :  { %v462_v4 = vadd.f32 %v461_v3, %v198_v56 }
 0x1cc   :  { %v562_v61 = vmul.f32 1.442695, %v554_v59 }
 0x1cd   :  { %v536_v5 = vsel %vm529_vm2, %v462_v4, -inf }
 0x1ce   :  { %537 = vmax.xlane.f32.xlu0 %v536_v5 }
 0x1d2   :  { %v464_v17 = vpop.f32.mrf.mxu2 }
 0x1d3   :  { %v492_v6 = vpop.f32.mrf.mxu3  ;;  %v465_v20 = vadd.f32 %v464_v17, %v199_v9 }
 0x1d4   :  { %v493_v7 = vadd.f32 %v492_v6, %v198_v56 }
 0x1d5   :  { %v539_v23 = vsel %vm529_vm2, %v465_v20, -inf }
 0x1d6   :  { %v542_v8 = vsel %vm529_vm2, %v493_v7, -inf }
 0x1d7   :  { %543 = vmax.xlane.f32.xlu1 %v542_v8 }
 0x1d9   :  { %v523_v11 = vpop.f32.mrf.mxu0 }
 0x1da   :  { %v524_v13 = vadd.f32 %v523_v11, %v198_v56 }
 0x1db   :  { %v495_v14 = vpop.f32.mrf.mxu3 }
 0x1dc   :  { %v496_v15 = vadd.f32 %v495_v14, %v199_v9  ;;  %v548_v16 = vsel %vm529_vm2, %v524_v13, -inf }
 0x1dd   :  { %549 = vmax.xlane.f32.xlu2 %v548_v16 }
 0x1de   :  { %v545_v18 = vsel %vm529_vm2, %v496_v15, -inf }
 0x1df   :  { %546 = vmax.xlane.f32.xlu0 %v545_v18  ;;  %534 = vmax.xlane.f32.xlu1 %v533_v19 }
 0x1e1   :  { %v526_v21 = vpop.f32.mrf.mxu0 }
 0x1e2   :  { %v527_v22 = vadd.f32 %v526_v21, %v199_v9 }
 0x1e4   :  { %v551_v24 = vsel %vm529_vm2, %v527_v22, -inf }
 0x1e5   :  { %540 = vmax.xlane.f32.xlu2 %v539_v23 }
 0x1e7   :  { %552 = vmax.xlane.f32.xlu1 %v551_v24 }
 0x241   :  { %v538_v25 = vpop.xlane.xlu0 %537 }
 0x242   :  { %v556_v26 = vsub.f32 %v462_v4, %v538_v25 }
 0x244   :  { %v566_v27 = vmul.f32 1.442695, %v556_v26 }
 0x246   :  { %925 = vpow2.f32 %v566_v27 }
 0x24a   :  { %v544_v29 = vpop.xlane.xlu1 %543 }
 0x24b   :  { %v558_v30 = vsub.f32 %v493_v7, %v544_v29 }
 0x24c   :  { %v1436_v31 = vpop.eup %925 }
 0x24d   :  { %v570_v32 = vmul.f32 1.442695, %v558_v30  ;;  %v584_v33 = vsel %vm529_vm2, %v1436_v31, 0.0 }
 0x24e   :  { %585 = vadd.xlane.f32.xlu0 %v584_v33 }
 0x24f   :  { %927 = vpow2.f32 %v570_v32 }
 0x250   :  { %v550_v34 = vpop.xlane.xlu2 %549 }
 0x251   :  { %v560_v35 = vsub.f32 %v524_v13, %v550_v34 }
 0x252   :  { %v535_v36 = vpop.xlane.xlu1 %534  ;;  %v547_v42 = vpop.xlane.xlu0 %546 }
 0x253   :  { %v574_v37 = vmul.f32 1.442695, %v560_v35  ;;  %v559_v48 = vsub.f32 %v496_v15, %v547_v42  ;;  %v555_v57 = vsub.f32 %v1428_v12, %v535_v36 }
 0x255   :  { %v1440_v38 = vpop.eup %927  ;;  %929 = vpow2.f32 %v574_v37  ;;  %v572_v50 = vmul.f32 1.442695, %v559_v48  ;;  %v564_v60 = vmul.f32 1.442695, %v555_v57 }
 0x256   :  { %v590_v39 = vsel %vm529_vm2, %v1440_v38, 0.0 }
 0x257   :  { %591 = vadd.xlane.f32.xlu2 %v590_v39 }
 0x258   :  { %v541_v40 = vpop.xlane.xlu2 %540 }
 0x259   :  { %v557_v41 = vsub.f32 %v465_v20, %v541_v40 }
 0x25a   :  { %v553_v43 = vpop.xlane.xlu1 %552 }
 0x25b   :  { %v1444_v44 = vpop.eup %929  ;;  %v568_v45 = vmul.f32 1.442695, %v557_v41  ;;  %v561_v46 = vsub.f32 %v527_v22, %v553_v43 }
 0x25c   :  { %v596_v47 = vsel %vm529_vm2, %v1444_v44, 0.0 }
 0x25d   :  { %931 = vpow2.f32 %v568_v45  ;;  %v576_v49 = vmul.f32 1.442695, %v561_v46  ;;  %597 = vadd.xlane.f32.xlu1 %v596_v47 }
 0x25f   :  { %933 = vpow2.f32 %v576_v49 }
 0x260   :  { %935 = vpow2.f32 %v572_v50 }
 0x261   :  { %937 = vpow2.f32 %v564_v60 }
 0x262   :  { %939 = vpow2.f32 %v562_v61 }
 0x263   :  { %v1448_v51 = vpop.eup %931 }
 0x264   :  { %v587_v52 = vsel %vm529_vm2, %v1448_v51, 0.0 }
 0x265   :  { %v1452_v53 = vpop.eup %933  ;;  %588 = vadd.xlane.f32.xlu0 %v587_v52 }
 0x266   :  { %v599_v54 = vsel %vm529_vm2, %v1452_v53, 0.0  ;;  %v1456_v55 = vpop.eup %935 }
 0x267   :  { %600 = vadd.xlane.f32.xlu2 %v599_v54  ;;  %v593_v56 = vsel %vm529_vm2, %v1456_v55, 0.0  ;;  %v1468_v62 = vpop.eup %937 }
 0x268   :  { %v1470_v63 = vpop.eup %939  ;;  %v581_v0 = vsel %vm529_vm2, %v1468_v62, 0.0 }
 0x269   :  { %v578_v1 = vsel %vm529_vm2, %v1470_v63, 0.0 }
 0x26f   :  { %594 = vadd.xlane.f32.xlu2 %v593_v56 }
 0x276   :  { %916 = vrot.lane.b32.xlu1 %v1424_v2, %s1248_s7 }
 0x279   :  { %911 = vrot.lane.b32.xlu0 %v1424_v2, %s1247_s9 }
 0x287   :  { %921 = vrot.lane.b32.xlu2 %v1424_v2, %s1249_s15 }
 0x2a0   :  { %582 = vadd.xlane.f32.xlu1 %v581_v0 }
 0x2a3   :  { %579 = vadd.xlane.f32.xlu0 %v578_v1 }
 0x2c1   :  { %v586_v4 = vpop.xlane.xlu0 %585 }
 0x2ca   :  { %v592_v2 = vpop.xlane.xlu2 %591 }
 0x2cb   :  { %941 = vrcp.f32 %v592_v2 }
 0x2d0   :  { %v598_v3 = vpop.xlane.xlu1 %597 }
 0x2d1   :  { %943 = vrcp.f32 %v598_v3  ;;  %v942_v5 = vpop.eup %941 }
 0x2d2   :  { %945 = vrcp.f32 %v586_v4  ;;  %v614_v9 = vmul.f32 %v942_v5, %v592_v2  ;;  %v792_v2 = vld [vmem:[#allocation13 + $0x18] sm:$0xff] }
 0x2d3   :  { %811 = vmatpush.msrb.mxu1 %v792_v2 }
 0x2d4   :  { %v622_v13 = vsub.f32 2.0, %v614_v9 }
 0x2d6   :  { %v630_v18 = vmul.f32 %v942_v5, %v622_v13 }
 0x2d7   :  { %v944_v6 = vpop.eup %943 }
 0x2d8   :  { %v589_v7 = vpop.xlane.xlu0 %588  ;;  %v946_v8 = vpop.eup %945  ;;  %v616_v10 = vmul.f32 %v944_v6, %v598_v3  ;;  %v638_v32 = vmul.f32 %v1440_v38, %v630_v18  ;;  %v790_v3 = vld [vmem:[#allocation13 + $0x8] sm:$0xff] }
 0x2d9   :  { %v612_v12 = vmul.f32 %v946_v8, %v586_v4  ;;  %v789_v4 = vld [vmem:[#allocation13] sm:$0xff] }
 0x2da   :  { %v601_v58 = vpop.xlane.xlu2 %600  ;;  %v624_v14 = vsub.f32 2.0, %v616_v10 }
 0x2db   :  { %947 = vrcp.f32 %v601_v58  ;;  %v620_v16 = vsub.f32 2.0, %v612_v12 }
 0x2dc   :  { %949 = vrcp.f32 %v589_v7  ;;  %v632_v22 = vmul.f32 %v944_v6, %v624_v14 }
 0x2dd   :  { %v628_v26 = vmul.f32 %v946_v8, %v620_v16 }
 0x2de   :  { %v640_v36 = vmul.f32 %v1444_v44, %v632_v22 }
 0x2df   :  { %v636_v40 = vmul.f32 %v1436_v31, %v628_v26 }
 0x2e1   :  { %v948_v15 = vpop.eup %947 }
 0x2e2   :  { %v595_v11 = vpop.xlane.xlu2 %594  ;;  %v950_v17 = vpop.eup %949  ;;  %v617_v23 = vmul.f32 %v948_v15, %v601_v58 }
 0x2e3   :  { %951 = vrcp.f32 %v595_v11  ;;  %v613_v27 = vmul.f32 %v950_v17, %v589_v7 }
 0x2e4   :  { %v625_v37 = vsub.f32 2.0, %v617_v23 }
 0x2e5   :  { %v621_v41 = vsub.f32 2.0, %v613_v27 }
 0x2e6   :  { %v633_v38 = vmul.f32 %v948_v15, %v625_v37 }
 0x2e7   :  { %v629_v43 = vmul.f32 %v950_v17, %v621_v41 }
 0x2e8   :  { %v917_v19 = vpop.permute.xlu1 %916  ;;  %v641_v44 = vmul.f32 %v1452_v53, %v633_v38 }
 0x2e9   :  { %v952_v20 = vpop.eup %951  ;;  %v918_v21 = vunpack.i.l.bf16 %v917_v19  ;;  %v919_v28 = vunpack.i.h.bf16 %v917_v19  ;;  %v637_v46 = vmul.f32 %v1448_v51, %v629_v43 }
 0x2ea   :  { %v615_v24 = vmul.f32 %v952_v20, %v595_v11  ;;  %v922_v25 = vpop.permute.xlu2 %921 }
 0x2eb   :  { %v923_v29 = vunpack.i.l.bf16 %v922_v25  ;;  %720 = vmatpush.msrb.mxu3 %v918_v21  ;;  %v912_v30 = vpop.permute.xlu0 %911  ;;  %v924_v35 = vunpack.i.h.bf16 %v922_v25 }
 0x2ec   :  { %v623_v33 = vsub.f32 2.0, %v615_v24  ;;  %v913_v34 = vunpack.i.l.bf16 %v912_v30  ;;  %v914_v39 = vunpack.i.h.bf16 %v912_v30 }
 0x2ed   :  { %721 = vmatpush.msrb.mxu3 %v919_v28  ;;  %749 = vmatpush.msrb.mxu0 %v923_v29 }
 0x2ee   :  { %691 = vmatpush.msrb.mxu2 %v913_v34  ;;  %878 = vmatmul.msk.f32.vlgmr.msrb.gmra.mxu3 %vm529_vm2, %v638_v32  ;;  %v631_v42 = vmul.f32 %v952_v20, %v623_v33 }
 0x2ef   :  { %750 = vmatpush.msrb.mxu0 %v924_v35 }
 0x2f0   :  { %692 = vmatpush.msrb.mxu2 %v914_v39  ;;  %880 = vmatmul.msk.f32.vlgmr.msrb.gmra.mxu0 %vm529_vm2, %v640_v36  ;;  %v639_v45 = vmul.f32 %v1456_v55, %v631_v42 }
 0x2f1   :  { %876 = vmatmul.msk.f32.vlgmr.msrb.gmra.mxu2 %vm529_vm2, %v636_v40 }
 0x2f6   :  { %879 = vmatmul.msk.f32.gmra.mxu3 %vm529_vm2, %v639_v45 }
 0x2f8   :  { %881 = vmatmul.msk.f32.gmra.mxu0 %vm529_vm2, %v641_v44 }
 0x2f9   :  { %877 = vmatmul.msk.f32.gmra.mxu2 %vm529_vm2, %v637_v46 }
 0x313   :  { %v583_v31 = vpop.xlane.xlu1 %582 }
 0x314   :  { %953 = vrcp.f32 %v583_v31 }
 0x316   :  { %v580_v47 = vpop.xlane.xlu0 %579 }
 0x317   :  { %955 = vrcp.f32 %v580_v47 }
 0x31a   :  { %v954_v48 = vpop.eup %953 }
 0x31b   :  { %v611_v52 = vmul.f32 %v954_v48, %v583_v31 }
 0x31d   :  { %v956_v49 = vpop.eup %955  ;;  %v619_v56 = vsub.f32 2.0, %v611_v52 }
 0x31e   :  { %v610_v50 = vmul.f32 %v956_v49, %v580_v47 }
 0x31f   :  { %v627_v51 = vmul.f32 %v954_v48, %v619_v56 }
 0x320   :  { %v618_v54 = vsub.f32 2.0, %v610_v50 }
 0x321   :  { %v635_v53 = vmul.f32 %v1468_v62, %v627_v51  ;;  %v791_v62 = vld [vmem:[#allocation13 + $0x10] sm:$0xff] }
 0x322   :  { %v626_v55 = vmul.f32 %v956_v49, %v618_v54  ;;  %812 = vmatpush.msrb.mxu1 %v791_v62 }
 0x324   :  { %v634_v57 = vmul.f32 %v1470_v63, %v626_v55  ;;  %813 = vmatpush.msrb.mxu1 %v790_v3 }
 0x326   :  { %874 = vmatmul.msk.f32.vlgmr.msra.gmra.mxu1 %vm529_vm2, %v634_v57 }
 0x327   :  { %814 = vmatpush.msrb.mxu1 %v789_v4 }
 0x32e   :  { %875 = vmatmul.msk.f32.gmra.mxu1 %vm529_vm2, %v635_v53 }
 0x36d   :  { %v752_v59 = vpop.f32.mrf.mxu0 }
 0x36e   :  { %776 = vrot.lane.b32.xlu2 %v752_v59, %s1250_s16 }
 0x371   :  { %v723_v0 = vpop.f32.mrf.mxu3 }
 0x374   :  { %v694_v60 = vpop.f32.mrf.mxu2 }
 0x375   :  { %v755_v61 = vpop.f32.mrf.mxu0 }
 0x376   :  { %760 = vrot.lane.b32.xlu2 %v694_v60, %s1237_s22  ;;  %778 = vrot.lane.b32.xlu1 %v755_v61, %s1250_s16 }
 0x379   :  { %v726_v63 = vpop.f32.mrf.mxu3 }
 0x37c   :  { %v697_v1 = vpop.f32.mrf.mxu2 }
 0x37d   :  { %762 = vrot.lane.b32.xlu0 %v697_v1, %s1237_s22 }
 0x37e   :  { %768 = vrot.lane.b32.xlu2 %v723_v0, %s1251_s17 }
 0x386   :  { %770 = vrot.lane.b32.xlu2 %v726_v63, %s1251_s17 }
 0x3a3   :  { %v665_v6 = vpop.f32.mrf.mxu1 }
 0x3ab   :  { %v668_v11 = vpop.f32.mrf.mxu1 }
 0x3c8   :  { %v777_v58 = vpop.permute.xlu2 %776 }
 0x3d0   :  { %v761_v5 = vpop.permute.xlu2 %760 }
 0x3d1   :  { %v782_v7 = vsel %vm404_vm1, %v665_v6, %v761_v5 }
 0x3d8   :  { %v769_v8 = vpop.permute.xlu2 %768 }
 0x3d9   :  { %v784_v9 = vsel %vm529_vm2, %v782_v7, %v769_v8 }
 0x3da   :  { %v787_v10 = vsel %vm786_vm3, %v784_v9, %v777_v58 }
 0x3db   :  { %882 = vmatmul.msk.f32.vlgmr.msrb.gmra.mxu1 %vm204_vm0, %v787_v10 }
 0x3e0   :  { %v771_v13 = vpop.permute.xlu2 %770 }
 0x3e8   :  { %v779_v15 = vpop.permute.xlu1 %778 }
 0x3ef   :  { %v763_v12 = vpop.permute.xlu0 %762 }
 0x3f0   :  { %v783_v14 = vsel %vm404_vm1, %v668_v11, %v763_v12 }
 0x3f1   :  { %v785_v16 = vsel %vm529_vm2, %v783_v14, %v771_v13 }
 0x3f2   :  { %v788_v17 = vsel %vm786_vm3, %v785_v16, %v779_v15 }
 0x3f3   :  { %883 = vmatmul.msk.f32.gmra.mxu1 %vm204_vm0, %v788_v17 }
 0x458   :  { %v816_v18 = vpop.f32.mrf.mxu1 }
 0x459   :  { %822 = vst.msk [vmem:[#allocation19] sm:$0xff] %vm204_vm0, %v816_v18 }
 0x470   :  { %v819_v19 = vpop.f32.mrf.mxu1 }
 0x471   :  { %823 = vst.msk [vmem:[#allocation19 + $0x8] sm:$0xff] %vm204_vm0, %v819_v19 }
 0x472   :  { %836 = dma.vmem_to_hbm [thread:$0]  %s829_s19, 256, %s831_s23, [#allocation4], %s1236_s21, %s1236_s21, %s1237_s22  }
 0x473   :  { %1233 = dma.done.wait [#allocation4], 256  }
 0x474   :  { %1234 = vsyncadd [#allocation4], 4294967040 }
 0x475   :  { %841 = vsyncpa [#allocation3], 1 }
 0x476   :  { %842 = vsyncpa [#allocation6], 1 }
 0x477   :  { %843 = vsyncpa [#allocation9], 1 }
 0x478   :  { %844 = vsyncpa [#allocation12], 1 }
 0x479   :  { %845 = vsyncpa [#allocation15], 1 }
 0x47a   :  { %846 = vsyncpa [#allocation18], 1 }
 0x47b   :  { %847 = vsyncpa [#allocation4], 1 }

</bundles_post_ra>
